<compile_context>
chip_gen: v6e
topology: v6e:2x2x1
jax: 0.10.0
libtpu: 0.0.40
codegen_flags: <defaults>
</compile_context>

<pallas_src>
import functools

import jax
import jax.numpy as jnp
from jax import lax
from jax.experimental import pallas as pl
from jax.experimental.pallas import tpu as pltpu


_SMALL_RUN_BYTES_DEFAULT = 2048   # v6e/v7x: below this, per-channel DMAs are inefficient
_SMALL_RUN_BYTES_V5 = 512         # v5's lower HBM roofline tolerates smaller runs


def _device_kind() -> str:
    try:
        return jax.devices()[0].device_kind.lower()
    except Exception:
        return ""


# ----------------------------------------------------------------------------
# Path A: VMEM-staged gather (small per-channel contiguous runs).
# ----------------------------------------------------------------------------
def _shuffle_vmem_kernel(idx_ref, x_ref, o_ref):
    """Channel gather with whole-slab VMEM staging.

    idx_ref: (C,) int32 in SMEM  -- output channel c comes from input channel idx_ref[c]
    x_ref:   (block_n, C, HW) VMEM -- fetched as one big contiguous slab per N-tile
    o_ref:   (block_n, C, HW) VMEM -- written back as one big contiguous slab

    The HBM traffic is the large contiguous slab DMAs handled by the BlockSpec
    pipeline; the permutation itself is cheap in-VMEM copies (lane-dense, HW
    lanes wide), which is free filler in a memory-bound regime.
    """
    n_ch = o_ref.shape[1]

    if n_ch <= 256:
        # Static unroll: store offsets are compile-time constants; only the
        # gather (load) offset is dynamic (read from the SMEM-resident perm).
        for c in range(n_ch):
            src = idx_ref[c]
            o_ref[:, pl.ds(c, 1), :] = x_ref[:, pl.ds(src, 1), :]
    else:
        def body(c, carry):
            src = idx_ref[c]
            o_ref[:, pl.ds(c, 1), :] = x_ref[:, pl.ds(src, 1), :]
            return carry

        lax.fori_loop(0, n_ch, body, 0, unroll=8)


def _channel_shuffle_vmem(x_flat, indices, *, block_budget_bytes, vmem_limit_bytes):
    N, C, HW = x_flat.shape
    itemsize = x_flat.dtype.itemsize
    row_bytes = C * HW * itemsize              # one batch element's contiguous slab

    # Largest batch tile that (a) divides N and (b) keeps the double-buffered
    # in+out pipeline (2 buffers each => ~4x block bytes) inside the budget.
    cap = max(1, block_budget_bytes // row_bytes)
    block_n = 1
    for d in range(min(N, cap), 0, -1):
        if N % d == 0:
            block_n = d
            break

    return pl.pallas_call(
        _shuffle_vmem_kernel,
        out_shape=jax.ShapeDtypeStruct((N, C, HW), x_flat.dtype),
        grid=(N // block_n,),
        in_specs=[
            pl.BlockSpec(memory_space=pltpu.MemorySpace.SMEM),    # indices -> SMEM
            pl.BlockSpec((block_n, C, HW), lambda n: (n, 0, 0)),  # contiguous slab
        ],
        out_specs=pl.BlockSpec((block_n, C, HW), lambda n: (n, 0, 0)),
        compiler_params=pltpu.CompilerParams(
            dimension_semantics=("parallel",),   # batch tiles are independent
            vmem_limit_bytes=vmem_limit_bytes,
        ),
    )(indices, x_flat)


# ----------------------------------------------------------------------------
# Path B: direct HBM->HBM DMA gather (large per-channel contiguous runs).
# ----------------------------------------------------------------------------
def _shuffle_dma_kernel(ring, chans_per_slice, idx_ref, x_hbm, o_hbm, copy_sems):
    """Channel gather via direct HBM->HBM DMAs.

    Grid axis 0 splits the output-channel range into contiguous slices; with
    "parallel" semantics each v7x TensorCore issues DMAs for its own slice
    (on v5e/v6e there is a single slice).

    idx_ref:   (C,) int32 in SMEM
    x_hbm:     (N, C, H*W) in HBM   -- DMA source, never touched by the TensorCore
    o_hbm:     (N, C, H*W) in HBM   -- DMA destination (written only via DMA)
    copy_sems: (ring,) DMA sems     -- up to `ring` channel copies in flight
    """
    n_ch = o_hbm.shape[1]
    lo = pl.program_id(0) * chans_per_slice   # first output channel of this slice

    def issue(c, src):
        # One strided HBM->HBM copy of the whole batch slab for output channel
        # lo + c:  x[:, src, :] -> o[:, lo + c, :]   (N * H*W elements).
        pltpu.make_async_copy(
            x_hbm.at[:, pl.ds(src, 1), :],
            o_hbm.at[:, pl.ds(lo + c, 1), :],
            copy_sems.at[c % ring],
        ).start()

    # Prime the ring (static unroll: `ring` / `chans_per_slice` are trace-time consts).
    for c in range(min(ring, chans_per_slice)):
        issue(c, idx_ref[lo + c])

    def body(c, carry):
        nxt = c + ring
        # Hoist the SMEM index read for the next copy ABOVE the DMA wait:
        # .wait() breaks SMEM sst->sld forwarding, so read the scalar first.
        src_next = idx_ref[jnp.minimum(lo + nxt, n_ch - 1)]

        # Drain the copy that produced output channel lo + c.  The waited
        # descriptor's (N, 1, H*W) slab shape is provably identical to the one
        # passed to issue(); only the source coordinate is a dummy.
        pltpu.make_async_copy(
            x_hbm.at[:, pl.ds(0, 1), :],
            o_hbm.at[:, pl.ds(lo + c, 1), :],
            copy_sems.at[c % ring],
        ).wait()

        # Reuse the slot we just drained for the next copy in the ring.
        @pl.when(nxt < chans_per_slice)
        def _():
            issue(nxt, src_next)

        return carry

    # Unrolled fori_loop gives the scheduler visibility across drain/issue pairs.
    lax.fori_loop(0, chans_per_slice, body, 0,
                  unroll=2 if chans_per_slice >= 2 else 1)


def _channel_shuffle_dma(x_flat, indices, *, is_v7):
    N, C, HW = x_flat.shape
    itemsize = x_flat.dtype.itemsize

    # v7x has 2 TensorCores per chip: split the channel loop across a parallel
    # grid axis so both cores issue DMA descriptors.  Single-core chips keep
    # one slice (an extra sequential grid step would only add overhead there).
    num_slices = 2 if (is_v7 and C % 2 == 0 and C >= 4) else 1
    chans_per_slice = C // num_slices

    # Adaptive DMA ring depth: small per-channel slabs complete quickly, so
    # more copies must be in flight to hide issue latency and shorten the
    # un-overlapped final drain tail.  DMA semaphores are nearly free.
    slab_bytes = N * HW * itemsize
    if slab_bytes < (256 << 10):
        ring = 32
    elif slab_bytes < (2 << 20):
        ring = 16
    else:
        ring = 8
    ring = max(1, min(ring, chans_per_slice))

    return pl.pallas_call(
        functools.partial(_shuffle_dma_kernel, ring, chans_per_slice),
        out_shape=jax.ShapeDtypeStruct((N, C, HW), x_flat.dtype),
        grid=(num_slices,),
        in_specs=[
            pl.BlockSpec(memory_space=pltpu.MemorySpace.SMEM),  # indices -> SMEM
            pl.BlockSpec(memory_space=pl.ANY),                  # x stays in HBM
        ],
        out_specs=pl.BlockSpec(memory_space=pl.ANY),            # written via DMA only
        scratch_shapes=[pltpu.SemaphoreType.DMA((ring,))],
        compiler_params=pltpu.CompilerParams(
            dimension_semantics=("parallel",),
        ),
    )(indices, x_flat)


# ----------------------------------------------------------------------------
# Dispatch wrapper.
# ----------------------------------------------------------------------------
def channel_shuffle(x: jax.Array, indices: jax.Array) -> jax.Array:
    """Equivalent of PyTorch `input[:, indices].contiguous()` for NCHW input.

    Contract: `indices` must hold values in [0, C) (the module's buffer comes
    from torch.randperm, so this always holds).  Concrete values are verified
    on the host; out-of-range indices are NOT silently clipped.
    """
    N, C, H, W = x.shape
    HW = H * W
    if indices.shape != (C,):
        raise ValueError(f"indices must have shape ({C},), got {indices.shape}")
    indices = indices.astype(jnp.int32)

    try:                                   # concrete (not traced) -> validate on host
        vals = jax.device_get(indices)
    except Exception:
        vals = None
    if vals is not None and ((vals < 0).any() or (vals >= C).any()):
        raise ValueError("indices out of range for the channel dimension")

    kind = _device_kind()
    is_v7 = "v7" in kind
    is_v5 = "v5" in kind

    itemsize = x.dtype.itemsize
    run_bytes = HW * itemsize              # contiguous bytes per (batch, channel) run
    row_bytes = C * HW * itemsize          # contiguous bytes per batch element

    # v5's lower HBM roofline tolerates smaller per-channel DMA runs before
    # descriptor overhead dominates; v6e/v7x switch to the staged path sooner.
    small_run_bytes = _SMALL_RUN_BYTES_V5 if is_v5 else _SMALL_RUN_BYTES_DEFAULT

    # VMEM budgeting: v7x has 64 MiB physical / 32 MiB default-scoped VMEM, so
    # keep staged blocks small enough that the 2-deep in+out pipeline fits;
    # v5e/v6e (128 MiB) can stage blocks twice as large.
    if is_v7:
        block_budget_bytes, vmem_limit_bytes = 7 << 20, 32 << 20
    else:
        block_budget_bytes, vmem_limit_bytes = 14 << 20, 64 << 20

    # Flatten the spatial dims (contiguous -> free): each channel slab becomes a
    # lane-dense (.., H*W) strip and all slices stay simple 3-D slices.
    x_flat = x.reshape(N, C, HW)

    if run_bytes < small_run_bytes and row_bytes <= block_budget_bytes:
        # Small per-channel runs: per-channel HBM DMAs would collapse below the
        # HBM roofline -> stage whole contiguous (C, H*W) slabs through VMEM.
        out_flat = _channel_shuffle_vmem(
            x_flat, indices,
            block_budget_bytes=block_budget_bytes,
            vmem_limit_bytes=vmem_limit_bytes)
    else:
        # Large per-channel runs: direct HBM->HBM DMA gather, no VMEM staging.
        out_flat = _channel_shuffle_dma(x_flat, indices, is_v7=is_v7)

    return out_flat.reshape(N, C, H, W)


if __name__ == "__main__":
    key = jax.random.PRNGKey(0)
    k_perm, k_x = jax.random.split(key)

    # Primary config from the module spec (f32, 16x16 spatial -> 1 KiB runs).
    N, C, H, W = 2, 4, 16, 16
    indices = jax.random.permutation(k_perm, jnp.arange(C, dtype=jnp.int32))
    x = jax.random.normal(k_x, (N, C, H, W), dtype=jnp.float32)

    out = jax.block_until_ready(channel_shuffle(x, indices))
    ref = x[:, indices]
    assert out.shape == (N, C, H, W)
    assert jnp.array_equal(out, ref), "mismatch vs reference gather (primary)"

    # Tiny spatial config (256 B runs): exercises the VMEM-staged path on every
    # TPU generation regardless of the per-chip threshold.
    k_p2, k_x2 = jax.random.split(jax.random.PRNGKey(1))
    x_small = jax.random.normal(k_x2, (2, 4, 8, 8), dtype=jnp.float32)
    idx_small = jax.random.permutation(k_p2, jnp.arange(4, dtype=jnp.int32))
    out_small = jax.block_until_ready(channel_shuffle(x_small, idx_small))
    assert jnp.array_equal(out_small, x_small[:, idx_small]), "VMEM-staged path mismatch"

    # Larger spatial config (4 KiB runs): exercises the direct HBM->HBM DMA path.
    k_p3, k_x3 = jax.random.split(jax.random.PRNGKey(2))
    x_big = jax.random.normal(k_x3, (2, 8, 32, 32), dtype=jnp.float32)
    idx_big = jax.random.permutation(k_p3, jnp.arange(8, dtype=jnp.int32))
    out_big = jax.block_until_ready(channel_shuffle(x_big, idx_big))
    assert jnp.array_equal(out_big, x_big[:, idx_big]), "HBM->HBM DMA path mismatch"

    print("KERNEL_OK")
</pallas_src>

<mosaic_0001>
module attributes {stable_mosaic.version = 11 : i64} {
  func.func @_shuffle_vmem_kernel(%arg0: i32, %arg1: memref<4xi32, #tpu.memory_space<smem>>, %arg2: memref<2x4x256xf32, #tpu.memory_space<vmem>>, %arg3: memref<2x4x256xf32, #tpu.memory_space<vmem>>) attributes {dimension_semantics = [#tpu.dimension_semantics<parallel>], iteration_bounds = array<i64: 1>, scalar_prefetch = 0 : i64, scratch_operands = 0 : i64, tpu.core_type = #tpu.core_type<tc>, window_params = [{transform_indices = @transform_0, window_bounds = array<i64: 4>}, {transform_indices = @transform_1, window_bounds = array<i64: 2, 4, 256>}, {transform_indices = @transform_2, window_bounds = array<i64: 2, 4, 256>}]} {
    %c0 = arith.constant 0 : index
    %0 = memref.load %arg1[%c0] : memref<4xi32, #tpu.memory_space<smem>>
    %c0_0 = arith.constant 0 : index
    %1 = arith.index_cast %0 : i32 to index
    %c0_1 = arith.constant 0 : index
    %2 = vector.load %arg2[%c0_0, %1, %c0_1] : memref<2x4x256xf32, #tpu.memory_space<vmem>>, vector<2x1x256xf32>
    %c0_2 = arith.constant 0 : index
    %c0_3 = arith.constant 0 : index
    %c0_4 = arith.constant 0 : index
    %3 = vector.load %arg3[%c0_2, %c0_3, %c0_4] : memref<2x4x256xf32, #tpu.memory_space<vmem>>, vector<2x1x256xf32>
    tpu.vector_store %arg3[%c0_2, %c0_3, %c0_4], %2 {strides = array<i32>} : memref<2x4x256xf32, #tpu.memory_space<vmem>>, vector<2x1x256xf32>,
    %c1 = arith.constant 1 : index
    %4 = memref.load %arg1[%c1] : memref<4xi32, #tpu.memory_space<smem>>
    %c0_5 = arith.constant 0 : index
    %5 = arith.index_cast %4 : i32 to index
    %c0_6 = arith.constant 0 : index
    %6 = vector.load %arg2[%c0_5, %5, %c0_6] : memref<2x4x256xf32, #tpu.memory_space<vmem>>, vector<2x1x256xf32>
    %c0_7 = arith.constant 0 : index
    %c1_8 = arith.constant 1 : index
    %c0_9 = arith.constant 0 : index
    %7 = vector.load %arg3[%c0_7, %c1_8, %c0_9] : memref<2x4x256xf32, #tpu.memory_space<vmem>>, vector<2x1x256xf32>
    tpu.vector_store %arg3[%c0_7, %c1_8, %c0_9], %6 {strides = array<i32>} : memref<2x4x256xf32, #tpu.memory_space<vmem>>, vector<2x1x256xf32>,
    %c2 = arith.constant 2 : index
    %8 = memref.load %arg1[%c2] : memref<4xi32, #tpu.memory_space<smem>>
    %c0_10 = arith.constant 0 : index
    %9 = arith.index_cast %8 : i32 to index
    %c0_11 = arith.constant 0 : index
    %10 = vector.load %arg2[%c0_10, %9, %c0_11] : memref<2x4x256xf32, #tpu.memory_space<vmem>>, vector<2x1x256xf32>
    %c0_12 = arith.constant 0 : index
    %c2_13 = arith.constant 2 : index
    %c0_14 = arith.constant 0 : index
    %11 = vector.load %arg3[%c0_12, %c2_13, %c0_14] : memref<2x4x256xf32, #tpu.memory_space<vmem>>, vector<2x1x256xf32>
    tpu.vector_store %arg3[%c0_12, %c2_13, %c0_14], %10 {strides = array<i32>} : memref<2x4x256xf32, #tpu.memory_space<vmem>>, vector<2x1x256xf32>,
    %c3 = arith.constant 3 : index
    %12 = memref.load %arg1[%c3] : memref<4xi32, #tpu.memory_space<smem>>
    %c0_15 = arith.constant 0 : index
    %13 = arith.index_cast %12 : i32 to index
    %c0_16 = arith.constant 0 : index
    %14 = vector.load %arg2[%c0_15, %13, %c0_16] : memref<2x4x256xf32, #tpu.memory_space<vmem>>, vector<2x1x256xf32>
    %c0_17 = arith.constant 0 : index
    %c3_18 = arith.constant 3 : index
    %c0_19 = arith.constant 0 : index
    %15 = vector.load %arg3[%c0_17, %c3_18, %c0_19] : memref<2x4x256xf32, #tpu.memory_space<vmem>>, vector<2x1x256xf32>
    tpu.vector_store %arg3[%c0_17, %c3_18, %c0_19], %14 {strides = array<i32>} : memref<2x4x256xf32, #tpu.memory_space<vmem>>, vector<2x1x256xf32>,
    return
  }
  func.func @transform_0(%arg0: i32) -> i32 {
    %c0_i32 = arith.constant 0 : i32
    %c0_i32_0 = arith.constant 0 : i32
    return %c0_i32 : i32
  }
  func.func @transform_1(%arg0: i32) -> (i32, i32, i32) {
    %c0_i32 = arith.constant 0 : i32
    %c0_i32_0 = arith.constant 0 : i32
    %c0_i32_1 = arith.constant 0 : i32
    return %arg0, %c0_i32, %c0_i32_0 : i32, i32, i32
  }
  func.func @transform_2(%arg0: i32) -> (i32, i32, i32) {
    %c0_i32 = arith.constant 0 : i32
    %c0_i32_0 = arith.constant 0 : i32
    %c0_i32_1 = arith.constant 0 : i32
    return %arg0, %c0_i32, %c0_i32_0 : i32, i32, i32
  }
}

</mosaic_0001>

<bundles_post_ra>
// kernel: tpu_custom_call.1
= control target key start
LH: loop header
LB: loop body
LE: loop exit
PB: predicated region body
PF: predicated region fallthrough
CT: control target
= control target key end

     0   :  { %7 = vsyncpa [#allocation5], 0  ;;  %s298_s0 = inlined_call_operand.hbm [shape: s32[4], index: 0, kind: input, shape index: {}]   ;;  %s299_s1 = inlined_call_operand.hbm [shape: f32[2,4,256], index: 1, kind: input, shape index: {}]   ;;  %s300_s2 = inlined_call_operand.hbm [shape: f32[2,4,256], index: 2, kind: output, shape index: {}]  }
   0x1   :  { %8 = vsyncpa [#allocation3], 0 }
   0x2   :  { %9 = vsyncpa [#allocation4], 0  ;;  %s236_s9 = smov [#allocation2]   ;;  %s237_s12 = smov [#allocation6]  }
   0x3   :  { %17 = dma.hbm_to_smem %s298_s0, 16, %s236_s9, [#allocation5]  }
   0x4   :  { %s23_s13 = sshll.u32 %s237_s12, 4  ;;  %s24_s13 = int_to_ptr.vmem [resolvable:$true] %s23_s13 }
   0x5   :  { %s198_s14 = scalar_lea.vmem %s24_s13, 256  ;;  %p203_p1 = scmp.lt.s32.totalorder %s24_s13, %s24_s13 }
   0x6   :  { %p199_p0 = scmp.ne.s32.totalorder %s24_s13, %s198_s14  ;;  %p204_p2 = scmp.lt.s32.totalorder %s198_s14, %s198_s14 }
   0x8   :  { %p205_p3 = por %p204_p2, %p203_p1 }
   0xa   :  { %p206_p4 = pnand %p205_p3, %p199_p0 }
   0xc   :  { %209 = shalt.err (!%p206_p4)
}
   0xd   :  { %s238_s15 = smov 128   ;;  %s239_s16 = smov 8  }
   0xe   :  { %29 = dma.hbm_to_vmem [thread:$0]  %s299_s1, 256, %s24_s13, [#allocation3], %s238_s15, %s238_s15, %s239_s16  }
   0xf   :  { %230 = dma.done.wait [#allocation5], 16  }
  0x10   :  { %231 = vsyncadd [#allocation5], 4294967280 }
  0x11   :  { %232 = dma.done.wait [#allocation3], 256  }
  0x12   :  { %233 = vsyncadd [#allocation3], 4294967040 }
  0x13   :  { %36 = sfence }
  0x14   :  { %s37_s0 = sld [smem:[#allocation2]]  ;;  %v50_v0 = vlaneseq  ;;  %s240_s22 = smov [#allocation7]  }
  0x15   :  { %s158_s19 = sld [smem:[#allocation2 + $0x1]]  ;;  %s267_s23 = sshll.u32 %s240_s22, 4  ;;  %s114_s23 = int_to_ptr.vmem [resolvable:$true] %s267_s23 }
  0x16   :  { %s163_s20 = sld [smem:[#allocation2 + $0x2]]  ;;  %vm269_vm0 = vcmp.lt.s32.totalorder %v50_v0, 256  ;;  %s210_s17 = scalar_lea.vmem %s114_s23, 256 }
  0x17   :  { %s265_s21 = sld [smem:[#allocation2 + $0x3]]  ;;  %p211_p5 = scmp.ne.s32.totalorder %s114_s23, %s210_s17 }
  0x18   :  { %p215_p6 = scmp.lt.s32.totalorder %s114_s23, %s114_s23  ;;  %p216_p7 = scmp.lt.s32.totalorder %s210_s17, %s210_s17 }
  0x1a   :  { %s38_s24 = sshra.s32 %s37_s0, 2  ;;  %s41_s25 = sand.u32 3, %s37_s0 }
  0x1b   :  { %s173_s26 = sshll.u32 %s38_s24, 3  ;;  %s58_s27 = sshra.s32 %s158_s19, 2 }
  0x1c   :  { %s44_s28 = sadd.s32 %s173_s26, %s41_s25  ;;  %s61_s1 = sand.u32 3, %s158_s19 }
  0x1d   :  { %s174_s29 = sshll.u32 %s58_s27, 3  ;;  %s45_s30 = scalar_lea.vmem [#allocation6], %s44_s28 }
  0x1e   :  { %v46_v2 = vld [vmem:[%s45_s30] ss:$4 sm:$0x3]  ;;  %v157_v3 = vld [vmem:[%s45_s30 + $0x8] ss:$4 sm:$0x3]  ;;  %s64_s3 = sadd.s32 %s174_s29, %s61_s1  ;;  %p217_p8 = por %p216_p7, %p215_p6 }
  0x1f   :  { %54 = vst.msk [vmem:[#allocation7] ss:$4 sm:$0x3] %vm269_vm0, %v46_v2  ;;  %56 = vst.msk [vmem:[#allocation7 + $0x8] ss:$4 sm:$0x3] %vm269_vm0, %v157_v3 }
  0x20   :  { %s75_s4 = sshra.s32 %s163_s20, 2  ;;  %s65_s5 = scalar_lea.vmem [#allocation6], %s64_s3 }
  0x21   :  { %v66_v4 = vld [vmem:[%s65_s5] ss:$4 sm:$0x3]  ;;  %v162_v5 = vld [vmem:[%s65_s5 + $0x8] ss:$4 sm:$0x3]  ;;  %p218_p9 = pnand %p217_p8, %p211_p5 }
  0x22   :  { %71 = vst.msk [vmem:[#allocation7 + $0x1] ss:$4 sm:$0x3] %vm269_vm0, %v66_v4  ;;  %73 = vst.msk [vmem:[#allocation7 + $0x9] ss:$4 sm:$0x3] %vm269_vm0, %v162_v5 }
  0x23   :  { %s78_s6 = sand.u32 3, %s163_s20  ;;  %s175_s7 = sshll.u32 %s75_s4, 3 }
  0x24   :  { %s81_s8 = sadd.s32 %s175_s7, %s78_s6  ;;  %s92_s9 = sshra.s32 %s265_s21, 2 }
  0x25   :  { %s95_s10 = sand.u32 3, %s265_s21  ;;  %s82_s11 = scalar_lea.vmem [#allocation6], %s81_s8 }
  0x26   :  { %v83_v6 = vld [vmem:[%s82_s11] ss:$4 sm:$0x3]  ;;  %v167_v7 = vld [vmem:[%s82_s11 + $0x8] ss:$4 sm:$0x3] }
  0x27   :  { %88 = vst.msk [vmem:[#allocation7 + $0x2] ss:$4 sm:$0x3] %vm269_vm0, %v83_v6  ;;  %90 = vst.msk [vmem:[#allocation7 + $0xa] ss:$4 sm:$0x3] %vm269_vm0, %v167_v7 }
  0x28   :  { %s176_s12 = sshll.u32 %s92_s9, 3 }
  0x29   :  { %s98_s13 = sadd.s32 %s176_s12, %s95_s10 }
  0x2a   :  { %s99_s14 = scalar_lea.vmem [#allocation6], %s98_s13 }
  0x2b   :  { %v100_v8 = vld [vmem:[%s99_s14] ss:$4 sm:$0x3]  ;;  %v172_v9 = vld [vmem:[%s99_s14 + $0x8] ss:$4 sm:$0x3] }
  0x2c   :  { %105 = vst.msk [vmem:[#allocation7 + $0x3] ss:$4 sm:$0x3] %vm269_vm0, %v100_v8  ;;  %107 = vst.msk [vmem:[#allocation7 + $0xb] ss:$4 sm:$0x3] %vm269_vm0, %v172_v9 }
  0x2d   :  { %221 = shalt.err (!%p218_p9)
}
  0x2e   :  { %119 = dma.vmem_to_hbm [thread:$0]  %s114_s23, 256, %s300_s2, [#allocation4], %s238_s15, %s238_s15, %s239_s16  }
  0x2f   :  { %234 = dma.done.wait [#allocation4], 256  }
  0x30   :  { %235 = vsyncadd [#allocation4], 4294967040 }
  0x31   :  { %123 = vsyncpa [#allocation3], 1 }
  0x32   :  { %124 = vsyncpa [#allocation4], 1 }
  0x33   :  { %125 = vsyncpa [#allocation5], 1 }

</bundles_post_ra>
